<compile_context>
chip_gen: v7x
topology: tpu7x:2x2x1
jax: 0.10.0
libtpu: 0.0.40
codegen_flags: <defaults>
</compile_context>

<pallas_src>
import jax
import jax.numpy as jnp
from jax import lax
from jax.experimental import pallas as pl
from jax.experimental.pallas import tpu as pltpu


def _make_kernel(H, W, compute_dtype):
    P = H * W
    s1 = (P - 1) % P        # roll by -1      -> x[p, q+1]
    sW = (P - W) % P        # roll by -W      -> x[p+1, q]
    sW1 = (P - W - 1) % P   # roll by -(W+1)  -> x[p+1, q+1]

    def kernel(x_ref, w_ref, b_ref, mq_ref, mp_ref, o_ref):
        # x_ref : (Cin, P)          one image, pixels (row-major) on lanes
        # w_ref : (4, 4*Cout, Cin)  shift-group weight blocks (grid-invariant)
        # b_ref : (4*Cout, 1)       per-parity-row bias (f32)
        # mq_ref: (1, P)            0 on last column, 1 elsewhere
        # mp_ref: (1, P)            0 on last row,    1 elsewhere
        # o_ref : (4*Cout, P)       lane-dense output tile
        x = jnp.maximum(x_ref[...], 0.0).astype(compute_dtype)   # fused ReLU + cast
        mq = mq_ref[...]
        mp = mp_ref[...]

        # Shifted taps via XLU lane rolls; wrap-around / cross-row bleed lands
        # exactly on the masked (zeroed) lanes.
        x01 = pltpu.roll(x, s1, 1) * mq
        x10 = pltpu.roll(x, sW, 1) * mp
        x11 = pltpu.roll(x, sW1, 1) * (mp * mq)

        # 4 accumulating MXU dots (no im2col concat), f32 accumulation.
        acc = jnp.dot(w_ref[0], x, preferred_element_type=jnp.float32)
        acc += jnp.dot(w_ref[1], x01, preferred_element_type=jnp.float32)
        acc += jnp.dot(w_ref[2], x10, preferred_element_type=jnp.float32)
        acc += jnp.dot(w_ref[3], x11, preferred_element_type=jnp.float32)
        o_ref[...] = (acc + b_ref[...]).astype(o_ref.dtype)

    return kernel


def transition_block_nobn2(x_nchw, w_t, bias, *, compute_dtype=jnp.bfloat16):
    """relu -> ConvTranspose2d(k=3, s=2, p=1, output_padding=1, bias).

    x_nchw: (N, Cin, H, W); w_t: (Cin, Cout, 3, 3) PyTorch ConvTranspose2d
    weight; bias: (Cout,).  Returns (N, Cout, 2H, 2W) float32.
    """
    N, Cin, H, W = x_nchw.shape
    Cout = w_t.shape[1]
    P = H * W

    # ---- weights: 4 shift-group blocks of shape (4*Cout, Cin) ----------------
    # Output parity (py, qx); shift group (sp, sq) means tap x[p+sp, q+sq].
    # 1-D tap map (parity, shift) -> kernel index; (0, 1) has no contribution.
    wt = jnp.transpose(w_t, (1, 0, 2, 3)).astype(jnp.float32)   # (Cout, Cin, ky, kx)
    zeros_cc = jnp.zeros((Cout, Cin), jnp.float32)
    tap = {(0, 0): 1, (1, 0): 2, (1, 1): 0}
    groups = []
    for sp in (0, 1):
        for sq in (0, 1):
            rows = []
            for py in (0, 1):
                for qx in (0, 1):
                    ky = tap.get((py, sp))
                    kx = tap.get((qx, sq))
                    rows.append(zeros_cc if (ky is None or kx is None)
                                else wt[:, :, ky, kx])
            groups.append(jnp.concatenate(rows, axis=0))        # (4*Cout, Cin)
    w_stack = jnp.stack(groups, axis=0).astype(compute_dtype)   # (4, 4*Cout, Cin)
    b_big = jnp.tile(bias.astype(jnp.float32), 4).reshape(4 * Cout, 1)

    # ---- precomputed border masks (0 on last column / last row) --------------
    cols = jnp.arange(P, dtype=jnp.int32)
    mask_q = ((cols % W) != (W - 1)).astype(compute_dtype).reshape(1, P)
    mask_p = ((cols // W) != (H - 1)).astype(compute_dtype).reshape(1, P)

    # ---- activations: contiguous reshape only (no transpose) -----------------
    x3d = x_nchw.reshape(N, Cin, P)

    # Per-image steps: roll masks stay valid at block boundaries, VMEM stays
    # bounded at production channel counts, and N>=4 gives both v7x TensorCores
    # pipelined work.  Weight / bias / mask blocks are grid-invariant
    # (index_map == const), so Pallas does not re-fetch them per step.
    grid = (N,)

    out_flat = pl.pallas_call(
        _make_kernel(H, W, compute_dtype),
        out_shape=jax.ShapeDtypeStruct((N, 4 * Cout, P), jnp.float32),
        grid_spec=pltpu.PrefetchScalarGridSpec(
            num_scalar_prefetch=0,
            grid=grid,
            in_specs=[
                pl.BlockSpec((pl.Squeezed(), Cin, P), lambda n: (n, 0, 0)),
                pl.BlockSpec((4, 4 * Cout, Cin), lambda n: (0, 0, 0)),
                pl.BlockSpec((4 * Cout, 1), lambda n: (0, 0)),
                pl.BlockSpec((1, P), lambda n: (0, 0)),
                pl.BlockSpec((1, P), lambda n: (0, 0)),
            ],
            out_specs=pl.BlockSpec((pl.Squeezed(), 4 * Cout, P),
                                   lambda n: (n, 0, 0)),
        ),
        compiler_params=pltpu.CompilerParams(
            dimension_semantics=("parallel",),
            vmem_limit_bytes=32 * 1024 * 1024),
    )(x3d, w_stack, b_big, mask_q, mask_p)

    # ---- depth-to-space: interleave the 4 parities back to (N, Cout, 2H, 2W) --
    out6 = out_flat.reshape(N, 2, 2, Cout, H, W)          # (n, py, qx, co, p, q)
    out = jnp.transpose(out6, (0, 3, 4, 1, 5, 2)).reshape(N, Cout, 2 * H, 2 * W)
    return out


def reference_forward(x, w_t, bias):
    """Plain-JAX NCHW reference for ConvTranspose2d(k=3, s=2, p=1, out_pad=1, bias)."""
    Cout = w_t.shape[1]
    xr = jnp.maximum(x, 0.0)
    # transposed conv == lhs-dilated correlation with the channel-transposed,
    # spatially flipped kernel; pad = (k-1-p, k-1-p+output_padding) = (1, 2)
    w_conv = jnp.flip(jnp.transpose(w_t, (1, 0, 2, 3)), axis=(2, 3))  # (Cout, Cin, 3, 3)
    out = lax.conv_general_dilated(
        xr, w_conv, window_strides=(1, 1),
        padding=((1, 2), (1, 2)), lhs_dilation=(2, 2),
        dimension_numbers=("NCHW", "OIHW", "NCHW"))
    return out + bias.reshape(1, Cout, 1, 1)


if __name__ == "__main__":
    # Small, module-consistent shapes.
    N, in_planes, out_planes, H, W = 2, 4, 4, 16, 16

    key = jax.random.PRNGKey(0)
    kx, kw, kb = jax.random.split(key, 3)
    x = jax.random.normal(kx, (N, in_planes, H, W), dtype=jnp.float32)
    # PyTorch ConvTranspose2d weight layout: (in_planes, out_planes, kH, kW) + bias.
    w = 0.1 * jax.random.normal(kw, (in_planes, out_planes, 3, 3), dtype=jnp.float32)
    b = 0.1 * jax.random.normal(kb, (out_planes,), dtype=jnp.float32)

    y_ref = jax.block_until_ready(reference_forward(x, w, b))

    # f32 operand path: bit-tight validation of the decomposition.
    y32 = jax.block_until_ready(
        transition_block_nobn2(x, w, b, compute_dtype=jnp.float32))
    assert y32.shape == (N, out_planes, 2 * H, 2 * W), y32.shape
    err32 = float(jnp.max(jnp.abs(y32 - y_ref)))
    assert jnp.allclose(y32, y_ref, atol=1e-4, rtol=1e-4), err32

    # bf16 operand path (default; f32 accumulation): looser tolerance.
    ybf = jax.block_until_ready(transition_block_nobn2(x, w, b))
    assert ybf.shape == (N, out_planes, 2 * H, 2 * W), ybf.shape
    errbf = float(jnp.max(jnp.abs(ybf - y_ref)))
    assert jnp.allclose(ybf, y_ref, atol=5e-2, rtol=5e-2), errbf

    print("KERNEL_OK")
</pallas_src>

<mosaic_0001>
module attributes {stable_mosaic.version = 11 : i64} {
  func.func @kernel(%arg0: i32, %arg1: memref<1x4x256xf32, #tpu.memory_space<vmem>>, %arg2: memref<4x16x4xf32, #tpu.memory_space<vmem>>, %arg3: memref<16x1xf32, #tpu.memory_space<vmem>>, %arg4: memref<1x256xf32, #tpu.memory_space<vmem>>, %arg5: memref<1x256xf32, #tpu.memory_space<vmem>>, %arg6: memref<1x16x256xf32, #tpu.memory_space<vmem>>) attributes {dimension_semantics = [#tpu.dimension_semantics<parallel>], iteration_bounds = array<i64: 2>, scalar_prefetch = 0 : i64, scratch_operands = 0 : i64, tpu.core_type = #tpu.core_type<tc>, window_params = [{transform_indices = @transform_0, window_bounds = array<i64: 1, 4, 256>}, {pipeline_mode = #tpu.pipeline_mode<synchronous>, transform_indices = @transform_1, window_bounds = array<i64: 4, 16, 4>}, {pipeline_mode = #tpu.pipeline_mode<synchronous>, transform_indices = @transform_2, window_bounds = array<i64: 16, 1>}, {pipeline_mode = #tpu.pipeline_mode<synchronous>, transform_indices = @transform_3, window_bounds = array<i64: 1, 256>}, {pipeline_mode = #tpu.pipeline_mode<synchronous>, transform_indices = @transform_4, window_bounds = array<i64: 1, 256>}, {transform_indices = @transform_5, window_bounds = array<i64: 1, 16, 256>}]} {
    %c0 = arith.constant 0 : index
    %c0_0 = arith.constant 0 : index
    %c0_1 = arith.constant 0 : index
    %0 = vector.load %arg1[%c0, %c0_0, %c0_1] : memref<1x4x256xf32, #tpu.memory_space<vmem>>, vector<1x4x256xf32>
    %1 = vector.shape_cast %0 : vector<1x4x256xf32> to vector<4x256xf32>
    %cst = arith.constant 0.000000e+00 : f32
    %2 = vector.broadcast %cst : f32 to vector<4x256xf32>
    %3 = arith.maximumf %1, %2 : vector<4x256xf32>
    %c0_2 = arith.constant 0 : index
    %c0_3 = arith.constant 0 : index
    %4 = vector.load %arg4[%c0_2, %c0_3] : memref<1x256xf32, #tpu.memory_space<vmem>>, vector<1x256xf32>
    %c0_4 = arith.constant 0 : index
    %c0_5 = arith.constant 0 : index
    %5 = vector.load %arg5[%c0_4, %c0_5] : memref<1x256xf32, #tpu.memory_space<vmem>>, vector<1x256xf32>
    %c255_i32 = arith.constant 255 : i32
    %6 = tpu.dynamic_rotate %3 by %c255_i32 dim 1 : vector<4x256xf32>, i32 -> vector<4x256xf32>
    %7 = vector.broadcast %4 : vector<1x256xf32> to vector<4x256xf32>
    %8 = arith.mulf %6, %7 : vector<4x256xf32>
    %c240_i32 = arith.constant 240 : i32
    %9 = tpu.dynamic_rotate %3 by %c240_i32 dim 1 : vector<4x256xf32>, i32 -> vector<4x256xf32>
    %10 = vector.broadcast %5 : vector<1x256xf32> to vector<4x256xf32>
    %11 = arith.mulf %9, %10 : vector<4x256xf32>
    %c239_i32 = arith.constant 239 : i32
    %12 = tpu.dynamic_rotate %3 by %c239_i32 dim 1 : vector<4x256xf32>, i32 -> vector<4x256xf32>
    %13 = arith.mulf %5, %4 : vector<1x256xf32>
    %14 = vector.broadcast %13 : vector<1x256xf32> to vector<4x256xf32>
    %15 = arith.mulf %12, %14 : vector<4x256xf32>
    %c0_6 = arith.constant 0 : index
    %c0_7 = arith.constant 0 : index
    %c0_8 = arith.constant 0 : index
    %16 = vector.load %arg2[%c0_6, %c0_7, %c0_8] : memref<4x16x4xf32, #tpu.memory_space<vmem>>, vector<1x16x4xf32>
    %17 = vector.shape_cast %16 : vector<1x16x4xf32> to vector<16x4xf32>
    %cst_9 = arith.constant dense<0.000000e+00> : vector<16x256xf32>
    %18 = tpu.matmul %17, %3, %cst_9 {dimension_numbers = #tpu.dot_dimension_numbers<[1], [0], [0], [1], [0, 0, 1, 1], [], []>} : vector<16x4xf32>, vector<4x256xf32>, vector<16x256xf32> -> vector<16x256xf32>
    %c1 = arith.constant 1 : index
    %c0_10 = arith.constant 0 : index
    %c0_11 = arith.constant 0 : index
    %19 = vector.load %arg2[%c1, %c0_10, %c0_11] : memref<4x16x4xf32, #tpu.memory_space<vmem>>, vector<1x16x4xf32>
    %20 = vector.shape_cast %19 : vector<1x16x4xf32> to vector<16x4xf32>
    %cst_12 = arith.constant dense<0.000000e+00> : vector<16x256xf32>
    %21 = tpu.matmul %20, %8, %cst_12 {dimension_numbers = #tpu.dot_dimension_numbers<[1], [0], [0], [1], [0, 0, 1, 1], [], []>} : vector<16x4xf32>, vector<4x256xf32>, vector<16x256xf32> -> vector<16x256xf32>
    %22 = arith.addf %18, %21 : vector<16x256xf32>
    %c2 = arith.constant 2 : index
    %c0_13 = arith.constant 0 : index
    %c0_14 = arith.constant 0 : index
    %23 = vector.load %arg2[%c2, %c0_13, %c0_14] : memref<4x16x4xf32, #tpu.memory_space<vmem>>, vector<1x16x4xf32>
    %24 = vector.shape_cast %23 : vector<1x16x4xf32> to vector<16x4xf32>
    %cst_15 = arith.constant dense<0.000000e+00> : vector<16x256xf32>
    %25 = tpu.matmul %24, %11, %cst_15 {dimension_numbers = #tpu.dot_dimension_numbers<[1], [0], [0], [1], [0, 0, 1, 1], [], []>} : vector<16x4xf32>, vector<4x256xf32>, vector<16x256xf32> -> vector<16x256xf32>
    %26 = arith.addf %22, %25 : vector<16x256xf32>
    %c3 = arith.constant 3 : index
    %c0_16 = arith.constant 0 : index
    %c0_17 = arith.constant 0 : index
    %27 = vector.load %arg2[%c3, %c0_16, %c0_17] : memref<4x16x4xf32, #tpu.memory_space<vmem>>, vector<1x16x4xf32>
    %28 = vector.shape_cast %27 : vector<1x16x4xf32> to vector<16x4xf32>
    %cst_18 = arith.constant dense<0.000000e+00> : vector<16x256xf32>
    %29 = tpu.matmul %28, %15, %cst_18 {dimension_numbers = #tpu.dot_dimension_numbers<[1], [0], [0], [1], [0, 0, 1, 1], [], []>} : vector<16x4xf32>, vector<4x256xf32>, vector<16x256xf32> -> vector<16x256xf32>
    %30 = arith.addf %26, %29 : vector<16x256xf32>
    %c0_19 = arith.constant 0 : index
    %c0_20 = arith.constant 0 : index
    %31 = vector.load %arg3[%c0_19, %c0_20] : memref<16x1xf32, #tpu.memory_space<vmem>>, vector<16x1xf32>
    %32 = vector.broadcast %31 : vector<16x1xf32> to vector<16x256xf32>
    %33 = arith.addf %30, %32 : vector<16x256xf32>
    %c0_21 = arith.constant 0 : index
    %c0_22 = arith.constant 0 : index
    %c0_23 = arith.constant 0 : index
    %34 = vector.load %arg6[%c0_21, %c0_22, %c0_23] : memref<1x16x256xf32, #tpu.memory_space<vmem>>, vector<1x16x256xf32>
    %35 = vector.shape_cast %34 : vector<1x16x256xf32> to vector<16x256xf32>
    %36 = vector.shape_cast %33 : vector<16x256xf32> to vector<1x16x256xf32>
    tpu.vector_store %arg6[%c0_21, %c0_22, %c0_23], %36 {strides = array<i32>} : memref<1x16x256xf32, #tpu.memory_space<vmem>>, vector<1x16x256xf32>,
    return
  }
  func.func @transform_0(%arg0: i32) -> (i32, i32, i32) {
    %c0_i32 = arith.constant 0 : i32
    %c0_i32_0 = arith.constant 0 : i32
    %c0_i32_1 = arith.constant 0 : i32
    return %arg0, %c0_i32, %c0_i32_0 : i32, i32, i32
  }
  func.func @transform_1(%arg0: i32) -> (i32, i32, i32) {
    %c0_i32 = arith.constant 0 : i32
    %c0_i32_0 = arith.constant 0 : i32
    %c0_i32_1 = arith.constant 0 : i32
    %c0_i32_2 = arith.constant 0 : i32
    return %c0_i32, %c0_i32_0, %c0_i32_1 : i32, i32, i32
  }
  func.func @transform_2(%arg0: i32) -> (i32, i32) {
    %c0_i32 = arith.constant 0 : i32
    %c0_i32_0 = arith.constant 0 : i32
    %c0_i32_1 = arith.constant 0 : i32
    return %c0_i32, %c0_i32_0 : i32, i32
  }
  func.func @transform_3(%arg0: i32) -> (i32, i32) {
    %c0_i32 = arith.constant 0 : i32
    %c0_i32_0 = arith.constant 0 : i32
    %c0_i32_1 = arith.constant 0 : i32
    return %c0_i32, %c0_i32_0 : i32, i32
  }
  func.func @transform_4(%arg0: i32) -> (i32, i32) {
    %c0_i32 = arith.constant 0 : i32
    %c0_i32_0 = arith.constant 0 : i32
    %c0_i32_1 = arith.constant 0 : i32
    return %c0_i32, %c0_i32_0 : i32, i32
  }
  func.func @transform_5(%arg0: i32) -> (i32, i32, i32) {
    %c0_i32 = arith.constant 0 : i32
    %c0_i32_0 = arith.constant 0 : i32
    %c0_i32_1 = arith.constant 0 : i32
    return %arg0, %c0_i32, %c0_i32_0 : i32, i32, i32
  }
}

</mosaic_0001>

<bundles_post_ra>
// kernel: tpu_custom_call.1
= control target key start
LH: loop header
LB: loop body
LE: loop exit
PB: predicated region body
PF: predicated region fallthrough
CT: control target
= control target key end

     0   :  { %10 = vsyncpa [#allocation3], 0  ;;  %s1135_s0 = inlined_call_operand.vmem [shape: f32[2,4,256], index: 0, kind: input, shape index: {}]   ;;  %s1136_s1 = inlined_call_operand.vmem [shape: f32[4,16,4], index: 1, kind: input, shape index: {}]   ;;  %s1137_s2 = inlined_call_operand.vmem [shape: f32[16,1], index: 2, kind: input, shape index: {}]   ;;  %s1138_s3 = inlined_call_operand.vmem [shape: f32[1,256], index: 3, kind: input, shape index: {}]   ;;  %s1139_s4 = inlined_call_operand.vmem [shape: f32[1,256], index: 4, kind: input, shape index: {}]   ;;  %s1140_s5 = inlined_call_operand.hbm [shape: f32[2,16,256], index: 5, kind: output, shape index: {}]  }
   0x1   :  { %12 = vsyncpa [#allocation3 + $0x1], 0  ;;  %s962_s18 = smov 0   ;;  %s964_s19 = smov 0  }
   0x2   :  { %s966_s20 = smov 0   ;;  %s968_s21 = smov 0  }
   0x3 LB: > { %s983_s22 = sadd.s32 4294967295, %s922_s21   ;;  %s764_s23 = sadd.s32 4294967294, %s922_s21   ;;  %s922_s21 = sphi %s968_s21, %s1146_s21   ;;  %s918_s20 = sphi %s966_s20, %s1145_s20   ;;  %s914_s19 = sphi %s964_s19, %s1144_s19   ;;  %s910_s18 = sphi %s962_s18, %s1143_s18  }
   0x4   : > { %s987_s24 = sadd.s32 1, %s922_s21   ;;  %s135_s25 = sadd.s32 1, %s918_s20 }
   0x5   : > { %s132_s26 = ssub.s32 %s922_s21, %s987_s24  ;;  %p145_p0 = scmp.ne.s32.totalorder %s918_s20, %s914_s19 }
   0x6   : > { %p133_p1 = scmp.eq.s32.totalorder %s132_s26, 0  ;;  %p146_p2 = scmp.eq.s32.totalorder %s983_s22, 1 }
   0x7   : > { %p151_p3 = scmp.ne.s32.totalorder %s914_s19, %s910_s18  ;;  %p152_p4 = scmp.eq.s32.totalorder %s764_s23, 1 }
   0x8   : > { %s998_s27 = scalar_select %p133_p1, %s918_s20, %s135_s25  }
   0x9   : > { %p1000_p5 = por %p146_p2, %p145_p0  ;;  %p1004_p6 = por %p152_p4, %p151_p3 }
   0xa   : > { %p767_p7 = scmp.ge.s32.totalorder %s922_s21, 1  ;;  %p190_p8 = scmp.lt.s32.totalorder %s922_s21, 3 }
   0xc   : > { %p191_p9 = pnand %p767_p7, %p190_p8 }
   0xd   : > { %p218_p10 = scmp.lt.s32.totalorder (!%p191_p9), %s983_s22, 1  ;;  %v924_v0 = vmov (!%p191_p9), 0.0   ;;  %s925_s10 = smov (!%p191_p9), 112   ;;  %v928_v4 = vmov (!%p191_p9), 0   ;;  %v668_v5 = vld [vmem:[%s1137_s2] sm:$0xff] (!%p191_p9)  ;;  %v669_v6 = vld [vmem:[%s1137_s2 + $0x8] sm:$0xff] (!%p191_p9)  ;;  %v234_v7 = vlaneseq (!%p191_p9) }
   0xe   : > { %194 = sbr.rel (%p191_p9) target bundleno = 396 (0x18c), region = 40  ;;  %376 = vmatprep.mubr.f32.mxu1 (!%p191_p9), %v924_v0  ;;  %555 = vmatprep.mubr.f32.mxu0 (!%p191_p9), %v924_v0  ;;  %s926_s11 = smov (!%p191_p9), 127   ;;  %v226_v12 = vld [vmem:[%s1139_s4] sm:$0x3] (!%p191_p9)  ;;  %vm305_vm2 = vcmask (!%p191_p9), 1043456   ;;  %v771_v33 = vld [vmem:[%s1136_s1 + $0x10] sm:$0xff] (!%p191_p9) }
   0xf   : > { %s927_s12 = smov (!%p191_p9), 111   ;;  %858 = vset.pattern.permute.xlu0 (!%p191_p9), %v928_v4  ;;  %859 = vset.pattern.permute.xlu1 (!%p191_p9), %v928_v4  ;;  %v241_v8 = vshrl.u32 (!%p191_p9), %v234_v7, 7  ;;  %v235_v9 = vand.u32 (!%p191_p9), 127, %v234_v7  ;;  %v225_v13 = vld [vmem:[%s1138_s3] sm:$0x3] (!%p191_p9)  ;;  %vm298_vm4 = vcmask (!%p191_p9), 31744  }
  0x10   : > { %v279_v16 = vmul.f32 (!%p191_p9), %v226_v12, %v225_v13  ;;  %v781_v34 = vld [vmem:[%s1136_s1 + $0x20] sm:$0xff] (!%p191_p9)  ;;  %v772_v41 = vld [vmem:[%s1136_s1 + $0x18] sm:$0xff] (!%p191_p9)  ;;  %v782_v42 = vld [vmem:[%s1136_s1 + $0x28] sm:$0xff] (!%p191_p9)  ;;  %s929_s14 = smov (!%p191_p9), [#allocation2]  }
  0x11   : > { %v242_v10 = vsub.s32 (!%p191_p9), 0, %v241_v8  ;;  %v246_v11 = vsub.s32 (!%p191_p9), 1, %v241_v8  ;;  %vm256_vm0 = vcmp.lt.s32.totalorder (!%p191_p9), %v235_v9, 112  ;;  %vm236_vm1 = vcmp.lt.s32.totalorder (!%p191_p9), %v235_v9, 127  ;;  %v293_v43 = vld [vmem:[%s1136_s1] sm:$0xff] (!%p191_p9)  ;;  %v787_v44 = vld [vmem:[%s1136_s1 + $0x30] sm:$0xff] (!%p191_p9) }
  0x12   : > { %vm276_vm3 = vcmp.lt.s32.totalorder (!%p191_p9), %v235_v9, 111  ;;  %v294_v45 = vld [vmem:[%s1136_s1 + $0x8] sm:$0xff] (!%p191_p9)  ;;  %v788_v46 = vld [vmem:[%s1136_s1 + $0x38] sm:$0xff] (!%p191_p9)  ;;  %s864_s15 = sshll.u32 (!%p191_p9), %s929_s14, 4  ;;  %s865_s15 = int_to_ptr.vmem [resolvable:$false] %s864_s15 }
  0x13   : > { %v263_v17 = vrot.slane (!%p191_p9), %v226_v12, %v242_v10  ;;  %v243_v18 = vrot.slane (!%p191_p9), %v225_v13, %v242_v10  ;;  %v267_v19 = vrot.slane (!%p191_p9), %v226_v12, %v246_v11  ;;  %v247_v20 = vrot.slane (!%p191_p9), %v225_v13, %v246_v11  ;;  %s866_s16 = scalar_lea.vmem (!%p191_p9), %s865_s15, 1024 }
  0x14   : > { %v284_v23 = vrot.slane (!%p191_p9), %v279_v16, %v242_v10  ;;  %v288_v24 = vrot.slane (!%p191_p9), %v279_v16, %v246_v11 }
  0x15   : > { %s219_s30 = scalar_select %p218_p10, %s983_s22, 1 }
  0x17   : > { %s798_s6 = sshll.u32 %s219_s30, 3  ;;  %s215_s30 = sand.u32 1, %s914_s19  }
  0x18   : > { %s222_s9 = scalar_lea.vmem %s1135_s0, %s798_s6  ;;  %s768_s6 = sshll.u32 %s215_s30, 5 }
  0x19   : > { %v223_v1 = vld [vmem:[%s222_s9] sm:$0xff]  ;;  %s217_s7 = scalar_lea.vmem [#allocation2], %s768_s6  ;;  %s799_s9 = sshll.u32 %s983_s22, 9 }
  0x1a   : > { %v1017_v2 = vmax.f32 %v223_v1, 0.0  ;;  %s702_s8 = sshll.u32 %s217_s7, 4  ;;  %s1094_s22 = scalar_lea.sflag [#allocation3], %s215_s30  ;;  %s1087_s8 = int_to_ptr.vmem [resolvable:$true] %s702_s8 }
  0x1b   : > { %s860_s13 = scalar_lea.vmem %s1087_s8, 512  ;;  %p867_p0 = scmp.lt.s32.totalorder %s1087_s8, %s865_s15 }
  0x1c   : > { %252 = vrot.lane.b32.xlu1 %v1017_v2, %s925_s10  ;;  %230 = vrot.lane.b32.xlu0 %v1017_v2, %s926_s11  ;;  %v228_v3 = vcombine.high %v1017_v2, %v1017_v2  ;;  %p861_p11 = scmp.ne.s32.totalorder %s1087_s8, %s860_s13  ;;  %p868_p1 = scmp.lt.s32.totalorder %s866_s16, %s860_s13 }
  0x1e   : > { %p862_p12 = pnand %p861_p11, %p1000_p5  ;;  %p869_p2 = por %p868_p1, %p867_p0 }
  0x20   : > { %254 = vrot.lane.b32.xlu1 %v228_v3, %s925_s10  ;;  %232 = vrot.lane.b32.xlu0 %v228_v3, %s926_s11  ;;  %p863_p13 = pneg %p862_p12 }
  0x22   : > { %p870_p3 = pnand %p869_p2, %p863_p13 }
  0x24   : > { %274 = vrot.lane.b32.xlu1 %v228_v3, %s927_s12  ;;  %272 = vrot.lane.b32.xlu0 %v1017_v2, %s927_s12  ;;  %s1092_s12 = scalar_lea.hbm %s1140_s5, %s799_s9 }
  0x28   : > { %672 = vperm.xlu0 %858, %v668_v5   ;;  %677 = vperm.xlu1 %859, %v669_v6  }
  0x8e   : > { %v253_v14 = vpop.permute.xlu1 %252  ;;  %v231_v15 = vpop.permute.xlu0 %230 }
  0x92   : > { %v255_v21 = vpop.permute.xlu1 %254  ;;  %v233_v22 = vpop.permute.xlu0 %232 }
  0x93   : > { %v257_v25 = vsel %vm256_vm0, %v253_v14, %v255_v21  ;;  %v258_v26 = vsel %vm256_vm0, %v255_v21, %v253_v14  ;;  %v237_v27 = vsel %vm236_vm1, %v231_v15, %v233_v22  ;;  %v238_v28 = vsel %vm236_vm1, %v233_v22, %v231_v15 }
  0x94   : > { %v270_v29 = vmul.f32 %v263_v17, %v257_v25  ;;  %v250_v30 = vmul.f32 %v243_v18, %v237_v27  ;;  %v271_v31 = vmul.f32 %v267_v19, %v258_v26  ;;  %v251_v32 = vmul.f32 %v247_v20, %v238_v28 }
  0x96   : > { %783 = vmatprep.subr.msk.mxu0 %vm305_vm2, %v271_v31  ;;  %v275_v35 = vpop.permute.xlu1 %274  ;;  %773 = vmatprep.subr.msk.mxu1 %vm305_vm2, %v251_v32  ;;  %v273_v36 = vpop.permute.xlu0 %272 }
  0x97   : > { %v277_v37 = vsel %vm276_vm3, %v273_v36, %v275_v35  ;;  %v278_v38 = vsel %vm276_vm3, %v275_v35, %v273_v36  ;;  %774 = vmatpush1.msk.msra.mxu1 %vm305_vm2, %v250_v30  ;;  %784 = vmatpush1.msk.msra.mxu0 %vm305_vm2, %v270_v29 }
  0x98   : > { %v291_v39 = vmul.f32 %v284_v23, %v277_v37  ;;  %v292_v40 = vmul.f32 %v288_v24, %v278_v38  ;;  %775 = vmatmul.mubr.msk.f32.vlgmr.msra.gmra.mrb[0].mxu1 %vm298_vm4, %v771_v33  ;;  %785 = vmatmul.mubr.msk.f32.vlgmr.msra.gmra.mrb[0].mxu0 %vm298_vm4, %v781_v34 }
  0x99   : > { %777 = vmatprep.subr.msk.mxu1 %vm305_vm2, %v228_v3  ;;  %382 = vmatprep.mubr.f32.mxu1 %v924_v0 }
  0x9a   : > { %789 = vmatprep.subr.msk.mxu0 %vm305_vm2, %v292_v40  ;;  %778 = vmatpush1.msk.msra.mxu1 %vm305_vm2, %v1017_v2 }
  0x9b   : > { %561 = vmatprep.mubr.f32.mxu0 %v924_v0  ;;  %790 = vmatpush1.msk.msra.mxu0 %vm305_vm2, %v291_v39 }
  0x9c   : > { %776 = vmatmul.mubr.msk.f32.gmra.mrb[2].mxu1 %vm298_vm4, %v772_v41  ;;  %786 = vmatmul.mubr.msk.f32.gmra.mrb[2].mxu0 %vm298_vm4, %v782_v42 }
  0x9d   : > { %463 = vmatprep.mubr.f32.mxu1 %v924_v0  ;;  %651 = vmatprep.mubr.f32.mxu0 %v924_v0 }
  0xa0   : > { %779 = vmatmul.mubr.msk.f32.vlgmr.msra.gmra.mrb[0].mxu1 %vm298_vm4, %v293_v43  ;;  %791 = vmatmul.mubr.msk.f32.vlgmr.msra.gmra.mrb[0].mxu0 %vm298_vm4, %v787_v44 }
  0xa1   : > { %469 = vmatprep.mubr.f32.mxu1 %v924_v0  ;;  %657 = vmatprep.mubr.f32.mxu0 %v924_v0 }
  0xa4   : > { %780 = vmatmul.mubr.msk.f32.gmra.mrb[2].mxu1 %vm298_vm4, %v294_v45  ;;  %792 = vmatmul.mubr.msk.f32.gmra.mrb[2].mxu0 %vm298_vm4, %v788_v46 }
  0xa7   : > { %v673_v47 = vpop.permute.xlu0 %672  ;;  %v678_v55 = vpop.permute.xlu1 %677 }
 0x173   : > { %v465_v48 = vpop.f32.mrb[0].mxu1  ;;  %v653_v49 = vpop.f32.mrb[0].mxu0 }
 0x174   : > { %v800_v50 = vadd.f32 %v653_v49, %v465_v48  ;;  %v467_v51 = vpop.f32.mrb[1].mxu1  ;;  %v655_v52 = vpop.f32.mrb[1].mxu0 }
 0x175   : > { %v801_v53 = vadd.f32 %v655_v52, %v467_v51 }
 0x176   : > { %v680_v54 = vadd.f32 %v800_v50, %v673_v47 }
 0x177   : > { %v681_v56 = vadd.f32 %v801_v53, %v673_v47  ;;  %v471_v57 = vpop.f32.mrb[2].mxu1  ;;  %v659_v58 = vpop.f32.mrb[2].mxu0 }
 0x178   : > { %684 = vst [vmem:[%s217_s7] sm:$0xff] %v680_v54  ;;  %v802_v59 = vadd.f32 %v659_v58, %v471_v57  ;;  %v473_v60 = vpop.f32.mrb[3].mxu1  ;;  %v661_v61 = vpop.f32.mrb[3].mxu0 }
 0x179   : > { %685 = vst [vmem:[%s217_s7 + $0x8] sm:$0xff] %v681_v56  ;;  %v803_v62 = vadd.f32 %v661_v61, %v473_v60 }
 0x17a   : > { %v682_v63 = vadd.f32 %v802_v59, %v678_v55 }
 0x17b   : > { %v683_v0 = vadd.f32 %v803_v62, %v678_v55 }
 0x17c   : > { %686 = vst [vmem:[%s217_s7 + $0x10] sm:$0xff] %v682_v63 }
 0x17d   : > { %687 = vst [vmem:[%s217_s7 + $0x18] sm:$0xff] %v683_v0 }
 0x17e   : > { %873 = shalt.err (!%p870_p3)
}
 0x17f   : > { %s874_s17 = scalar_lea.hbm %s1092_s12, 512  ;;  %s878_s26 = scalar_lea.hbm %s1140_s5, 1024 }
 0x180   : > { %p875_p4 = scmp.ne.s32.totalorder %s1092_s12, %s874_s17  ;;  %p879_p9 = scmp.lt.u32.totalorder %s1092_s12, %s1140_s5 }
 0x181   : > { %p880_p10 = scmp.lt.u32.totalorder %s878_s26, %s874_s17  ;;  %p882_p12 = scmp.lt.u32.totalorder %s874_s17, %s1092_s12 }
 0x182   : > { %p876_p7 = pnand %p875_p4, %p1000_p5 }
 0x183   : > { %p881_p11 = por %p880_p10, %p879_p9 }
 0x184   : > { %p877_p8 = pneg %p876_p7 }
 0x185   : > { %p883_p13 = por %p882_p12, %p881_p11 }
 0x187   : > { %p884_p0 = pnand %p883_p13, %p877_p8 }
 0x189   : > { %887 = shalt.err (!%p884_p0)
}
 0x18a   : > { %s930_s7 = smov 256   ;;  %s931_s9 = smov 16  }
 0x18b   : > { %812 = dma.vmem_to_hbm [thread:$0]  (%p1000_p5), %s1087_s8, 512, %s1092_s12, %s1094_s22, %s930_s7, %s930_s7, %s931_s9  }
 0x18c PF: > { %p818_p1 = scmp.ge.s32.totalorder %s922_s21, 2  ;;  %s717_s10 = sand.u32 1, %s910_s18  }
 0x18d   : > { %s718_s11 = scalar_lea.sflag [#allocation3], %s717_s10 }
 0x18e   : > { %p815_p2 = pnand %p818_p1, %p1004_p6 }
 0x190   : > { %905 = dma.done.wait (!%p815_p2), %s718_s11, 512  }
 0x191   : > { %907 = vsyncadd (!%p815_p2), %s718_s11, 4294966784  ;;  %p15_p3 = scmp.ge.s32.totalorder %s987_s24, 4   ;;  %s1143_s18 = smov %s914_s19 }
 0x192   : > { %s1144_s19 = smov %s918_s20  ;;  %s1145_s20 = smov %s998_s27 }
 0x193   : > { %s1146_s21 = smov %s987_s24  ;;  %17 = sbr.rel (!%p15_p3) target bundleno = 3 (0x3), region = 78 }
 0x19a   :  { %723 = vsyncpa [#allocation3], 1 }
 0x19b   :  { %725 = vsyncpa [#allocation3 + $0x1], 1 }

</bundles_post_ra>
